<compile_context>
chip_gen: v7x
topology: tpu7x:2x2x1
jax: 0.10.0
libtpu: 0.0.40
codegen_flags: <defaults>
</compile_context>

<pallas_src>
import functools

import jax
import jax.numpy as jnp
from jax.experimental import pallas as pl
from jax.experimental.pallas import tpu as pltpu


def _round_up(x, m):
    return ((x + m - 1) // m) * m


def _make_mlp_kernel(n_in, two_layer, final_relu, mxu_dtype=None):
    """o = [relu](relu(sum_k x_k @ W1_k + b1) [@ W2 + b2])."""

    def kernel(*refs):
        idx = 0
        xs = refs[idx:idx + n_in]; idx += n_in
        w1s = refs[idx:idx + n_in]; idx += n_in
        b1 = refs[idx]; idx += 1
        if two_layer:
            w2, b2 = refs[idx], refs[idx + 1]; idx += 2
        o = refs[idx]

        h = None
        for x_ref, w_ref in zip(xs, w1s):
            x, w = x_ref[...], w_ref[...]
            if mxu_dtype is not None:
                x, w = x.astype(mxu_dtype), w.astype(mxu_dtype)
            part = jnp.dot(x, w, preferred_element_type=jnp.float32)
            h = part if h is None else h + part
        h = jnp.maximum(h + b1[...], 0.0)

        if two_layer:
            h2, w2v = h, w2[...]
            if mxu_dtype is not None:
                h2, w2v = h2.astype(mxu_dtype), w2v.astype(mxu_dtype)
            y = jnp.dot(h2, w2v, preferred_element_type=jnp.float32) + b2[...]
            if final_relu:
                y = jnp.maximum(y, 0.0)
        else:
            y = h
        o[...] = y.astype(o.dtype)

    return kernel


def fused_mlp(xs, w1s, b1, w2=None, b2=None, *, final_relu=True,
              row_tile=512, mxu_dtype=None, out_dtype=jnp.float32):
    """Concat-fused 1- or 2-layer MLP over row-aligned inputs.

    xs  : list of [rows, d_k] arrays sharing the row dimension (logical concat).
    w1s : list of [d_k, H] weight slices (w1s[k] multiplies xs[k]).
    b1  : [1, H]; w2 : [H, out] or None; b2 : [1, out] or None.
    """
    assert len(xs) == len(w1s)
    rows = xs[0].shape[0]
    hidden = w1s[0].shape[1]
    out_dim = hidden if w2 is None else w2.shape[1]
    two_layer = w2 is not None

    # Largest row tile <= row_tile (multiple of 8 sublanes); pad rows to tile.
    tm = min(row_tile, _round_up(rows, 8))
    padded = _round_up(rows, tm)
    if padded != rows:
        xs = [jnp.pad(x, ((0, padded - rows), (0, 0))) for x in xs]
    grid = (padded // tm,)

    args, in_specs = [], []
    for x in xs:                                   # row-tiled, auto-pipelined
        args.append(x)
        in_specs.append(pl.BlockSpec((tm, x.shape[1]), lambda i: (i, 0)))
    for w in w1s:                                  # resident in VMEM (const block idx)
        args.append(w)
        in_specs.append(pl.BlockSpec(w.shape, lambda i: (0, 0)))
    args.append(b1)
    in_specs.append(pl.BlockSpec(b1.shape, lambda i: (0, 0)))
    if two_layer:
        args += [w2, b2]
        in_specs += [pl.BlockSpec(w2.shape, lambda i: (0, 0)),
                     pl.BlockSpec(b2.shape, lambda i: (0, 0))]

    kernel = _make_mlp_kernel(len(xs), two_layer, final_relu, mxu_dtype)
    out = pl.pallas_call(
        kernel,
        out_shape=jax.ShapeDtypeStruct((padded, out_dim), out_dtype),
        grid=grid,
        in_specs=in_specs,
        out_specs=pl.BlockSpec((tm, out_dim), lambda i: (i, 0)),
        compiler_params=pltpu.CompilerParams(
            dimension_semantics=("parallel",)),    # shard row tiles across v7x's 2 TCs
    )(*args)
    return out[:rows]


def init_propnet_params(key, node_dim_in, edge_dim_in, hidden_dim,
                        node_dim_out, edge_dim_out, pstep):
    """PyTorch nn.Linear-style init; weights stored as [in, out] (x @ W)."""
    def linear(k, fan_in, fan_out):
        kw, kb = jax.random.split(k)
        bound = 1.0 / jnp.sqrt(fan_in)
        w = jax.random.uniform(kw, (fan_in, fan_out), jnp.float32, -bound, bound)
        b = jax.random.uniform(kb, (1, fan_out), jnp.float32, -bound, bound)
        return w, b

    keys = jax.random.split(key, 6 + 2 * pstep)
    p = {}
    p['node_enc_w'], p['node_enc_b'] = linear(keys[0], node_dim_in, hidden_dim)
    p['edge_enc_w'], p['edge_enc_b'] = linear(
        keys[1], node_dim_in * 2 + edge_dim_in, hidden_dim)
    p['node_prop_w1'], p['node_prop_b1'] = linear(keys[2], hidden_dim * 3, hidden_dim)
    p['node_prop_w2'], p['node_prop_b2'] = linear(keys[3], hidden_dim, hidden_dim)
    for i in range(pstep):
        p[f'edge_prop{i}_w1'], p[f'edge_prop{i}_b1'] = linear(
            keys[4 + 2 * i], hidden_dim * 3, hidden_dim)
        p[f'edge_prop{i}_w2'], p[f'edge_prop{i}_b2'] = linear(
            keys[5 + 2 * i], hidden_dim, hidden_dim)
    p['edge_pred_w1'], p['edge_pred_b1'] = linear(
        keys[4 + 2 * pstep], hidden_dim * 2, hidden_dim)
    p['edge_pred_w2'], p['edge_pred_b2'] = linear(
        keys[5 + 2 * pstep], hidden_dim, edge_dim_out)
    return p


def propnet_forward(params, node_rep, edge_rep=None, *, pstep=2,
                    row_tile=512, mxu_dtype=None):
    """PropNet.forward with ignore_node=True: returns edge_pred [B,N,N,R,E_out]."""
    B, N, R, Dn = node_rep.shape
    H = params['node_enc_w'].shape[1]
    mlp = functools.partial(fused_mlp, row_tile=row_tile, mxu_dtype=mxu_dtype)

    # --- node encoder: relu(x @ W + b) over B*N*R rows ---
    node_enc = mlp([node_rep.reshape(-1, Dn)],
                   [params['node_enc_w']], params['node_enc_b'])
    node_enc = node_enc.reshape(B, N, R, H)

    # --- edge encoder over B*N*N*R (receiver, sender[, edge]) rows ---
    rep_r = jnp.broadcast_to(node_rep[:, :, None], (B, N, N, R, Dn)).reshape(-1, Dn)
    rep_s = jnp.broadcast_to(node_rep[:, None, :], (B, N, N, R, Dn)).reshape(-1, Dn)
    we = params['edge_enc_w']
    xs, ws = [rep_r, rep_s], [we[:Dn], we[Dn:2 * Dn]]
    if edge_rep is not None:
        De = edge_rep.shape[-1]
        xs.append(edge_rep.reshape(-1, De))
        ws.append(we[2 * Dn:])
    edge_enc = mlp(xs, ws, params['edge_enc_b']).reshape(B, N, N, R, H)

    # TODO(synk): edge_type gating uses self.edge_type_num, which is never
    # defined in the reference module's __init__; only the edge_type=None path
    # is implemented.

    node_effect, edge_effect = node_enc, edge_enc
    for i in range(pstep):
        eff_r = jnp.broadcast_to(node_effect[:, :, None], (B, N, N, R, H)).reshape(-1, H)
        eff_s = jnp.broadcast_to(node_effect[:, None, :], (B, N, N, R, H)).reshape(-1, H)
        w1 = params[f'edge_prop{i}_w1']
        new_edge_effect = mlp(
            [eff_r, eff_s, edge_effect.reshape(-1, H)],
            [w1[:H], w1[H:2 * H], w1[2 * H:]], params[f'edge_prop{i}_b1'],
            params[f'edge_prop{i}_w2'], params[f'edge_prop{i}_b2'],
            final_relu=True,
        ).reshape(B, N, N, R, H)

        edge_agg = new_edge_effect.sum(axis=2)                      # [B, N, R, H]
        w1n = params['node_prop_w1']
        new_node_effect = mlp(
            [node_enc.reshape(-1, H), node_effect.reshape(-1, H),
             edge_agg.reshape(-1, H)],
            [w1n[:H], w1n[H:2 * H], w1n[2 * H:]], params['node_prop_b1'],
            params['node_prop_w2'], params['node_prop_b2'],
            final_relu=True,
        ).reshape(B, N, R, H)

        node_effect, edge_effect = new_node_effect, new_edge_effect

    # --- edge predictor on cat([edge_effect, edge_enc], -1); no final ReLU ---
    w1p = params['edge_pred_w1']
    edge_pred = mlp(
        [edge_effect.reshape(-1, H), edge_enc.reshape(-1, H)],
        [w1p[:H], w1p[H:]], params['edge_pred_b1'],
        params['edge_pred_w2'], params['edge_pred_b2'],
        final_relu=False,
    )
    # TODO(synk): node_predictor (ignore_node=False branch) is referenced in
    # forward() but never defined in the reference __init__, so only the edge
    # prediction path (ignore_node=True) is implemented.
    return edge_pred.reshape(B, N, N, R, -1)


def propnet_forward_ref(params, node_rep, edge_rep=None, *, pstep=2):
    """Pure-JAX reference mirroring the PyTorch forward (ignore_node=True)."""
    B, N, R, Dn = node_rep.shape
    H = params['node_enc_w'].shape[1]

    def lin_relu(x, w, b):
        return jnp.maximum(x @ w + b, 0.0)

    node_enc = lin_relu(node_rep.reshape(-1, Dn), params['node_enc_w'],
                        params['node_enc_b']).reshape(B, N, R, H)
    rep_r = jnp.broadcast_to(node_rep[:, :, None], (B, N, N, R, Dn))
    rep_s = jnp.broadcast_to(node_rep[:, None, :], (B, N, N, R, Dn))
    cat = [rep_r, rep_s] + ([edge_rep] if edge_rep is not None else [])
    tmp = jnp.concatenate(cat, -1).reshape(B * N * N * R, -1)
    edge_enc = lin_relu(tmp, params['edge_enc_w'],
                        params['edge_enc_b']).reshape(B, N, N, R, H)

    node_effect, edge_effect = node_enc, edge_enc
    for i in range(pstep):
        eff_r = jnp.broadcast_to(node_effect[:, :, None], (B, N, N, R, H))
        eff_s = jnp.broadcast_to(node_effect[:, None, :], (B, N, N, R, H))
        tmp = jnp.concatenate([eff_r, eff_s, edge_effect], -1).reshape(-1, 3 * H)
        h = lin_relu(tmp, params[f'edge_prop{i}_w1'], params[f'edge_prop{i}_b1'])
        new_edge = lin_relu(h, params[f'edge_prop{i}_w2'],
                            params[f'edge_prop{i}_b2']).reshape(B, N, N, R, H)
        agg = new_edge.sum(axis=2)
        tmp = jnp.concatenate([node_enc, node_effect, agg], -1).reshape(-1, 3 * H)
        h = lin_relu(tmp, params['node_prop_w1'], params['node_prop_b1'])
        new_node = lin_relu(h, params['node_prop_w2'],
                            params['node_prop_b2']).reshape(B, N, R, H)
        node_effect, edge_effect = new_node, new_edge

    tmp = jnp.concatenate([edge_effect, edge_enc], -1).reshape(-1, 2 * H)
    h = lin_relu(tmp, params['edge_pred_w1'], params['edge_pred_b1'])
    pred = h @ params['edge_pred_w2'] + params['edge_pred_b2']
    return pred.reshape(B, N, N, R, -1)


if __name__ == "__main__":
    key = jax.random.PRNGKey(0)
    k_param, k_x = jax.random.split(key)

    # Small shapes consistent with PropNet's forward: node_rep is [B, N, R, node_dim_in]
    B, N, R = 2, 3, 4
    NODE_DIM_IN, EDGE_DIM_IN, HIDDEN = 16, 0, 64
    NODE_DIM_OUT, EDGE_DIM_OUT, PSTEP = 8, 4, 2

    params = init_propnet_params(k_param, NODE_DIM_IN, EDGE_DIM_IN, HIDDEN,
                                 NODE_DIM_OUT, EDGE_DIM_OUT, PSTEP)
    node_rep = jax.random.normal(k_x, (B, N, R, NODE_DIM_IN), dtype=jnp.float32)

    out = propnet_forward(params, node_rep, pstep=PSTEP)
    out = jax.block_until_ready(out)

    ref = propnet_forward_ref(params, node_rep, pstep=PSTEP)
    assert out.shape == (B, N, N, R, EDGE_DIM_OUT), out.shape
    max_err = float(jnp.max(jnp.abs(out - ref)))
    assert jnp.allclose(out, ref, atol=1e-4, rtol=1e-4), max_err

    print("KERNEL_OK")
</pallas_src>

<mosaic_0001>
module attributes {stable_mosaic.version = 11 : i64} {
  func.func @kernel(%arg0: i32, %arg1: memref<24x16xf32, #tpu.memory_space<vmem>>, %arg2: memref<16x64xf32, #tpu.memory_space<vmem>>, %arg3: memref<1x64xf32, #tpu.memory_space<vmem>>, %arg4: memref<24x64xf32, #tpu.memory_space<vmem>>) attributes {dimension_semantics = [#tpu.dimension_semantics<parallel>], iteration_bounds = array<i64: 1>, scalar_prefetch = 0 : i64, scratch_operands = 0 : i64, tpu.core_type = #tpu.core_type<tc>, window_params = [{transform_indices = @transform_0, window_bounds = array<i64: 24, 16>}, {pipeline_mode = #tpu.pipeline_mode<synchronous>, transform_indices = @transform_1, window_bounds = array<i64: 16, 64>}, {pipeline_mode = #tpu.pipeline_mode<synchronous>, transform_indices = @transform_2, window_bounds = array<i64: 1, 64>}, {transform_indices = @transform_3, window_bounds = array<i64: 24, 64>}]} {
    %c0 = arith.constant 0 : index
    %c0_0 = arith.constant 0 : index
    %0 = vector.load %arg1[%c0, %c0_0] : memref<24x16xf32, #tpu.memory_space<vmem>>, vector<24x16xf32>
    %c0_1 = arith.constant 0 : index
    %c0_2 = arith.constant 0 : index
    %1 = vector.load %arg2[%c0_1, %c0_2] : memref<16x64xf32, #tpu.memory_space<vmem>>, vector<16x64xf32>
    %cst = arith.constant dense<0.000000e+00> : vector<24x64xf32>
    %2 = tpu.matmul %0, %1, %cst {dimension_numbers = #tpu.dot_dimension_numbers<[1], [0], [0], [1], [0, 0, 1, 1], [], []>} : vector<24x16xf32>, vector<16x64xf32>, vector<24x64xf32> -> vector<24x64xf32>
    %c0_3 = arith.constant 0 : index
    %c0_4 = arith.constant 0 : index
    %3 = vector.load %arg3[%c0_3, %c0_4] : memref<1x64xf32, #tpu.memory_space<vmem>>, vector<1x64xf32>
    %4 = vector.broadcast %3 : vector<1x64xf32> to vector<24x64xf32>
    %5 = arith.addf %2, %4 : vector<24x64xf32>
    %cst_5 = arith.constant 0.000000e+00 : f32
    %6 = vector.broadcast %cst_5 : f32 to vector<24x64xf32>
    %7 = arith.maximumf %5, %6 : vector<24x64xf32>
    %c0_6 = arith.constant 0 : index
    %c0_7 = arith.constant 0 : index
    %8 = vector.load %arg4[%c0_6, %c0_7] : memref<24x64xf32, #tpu.memory_space<vmem>>, vector<24x64xf32>
    tpu.vector_store %arg4[%c0_6, %c0_7], %7 {strides = array<i32>} : memref<24x64xf32, #tpu.memory_space<vmem>>, vector<24x64xf32>,
    return
  }
  func.func @transform_0(%arg0: i32) -> (i32, i32) {
    %c0_i32 = arith.constant 0 : i32
    %c0_i32_0 = arith.constant 0 : i32
    return %arg0, %c0_i32 : i32, i32
  }
  func.func @transform_1(%arg0: i32) -> (i32, i32) {
    %c0_i32 = arith.constant 0 : i32
    %c0_i32_0 = arith.constant 0 : i32
    %c0_i32_1 = arith.constant 0 : i32
    return %c0_i32, %c0_i32_0 : i32, i32
  }
  func.func @transform_2(%arg0: i32) -> (i32, i32) {
    %c0_i32 = arith.constant 0 : i32
    %c0_i32_0 = arith.constant 0 : i32
    %c0_i32_1 = arith.constant 0 : i32
    return %c0_i32, %c0_i32_0 : i32, i32
  }
  func.func @transform_3(%arg0: i32) -> (i32, i32) {
    %c0_i32 = arith.constant 0 : i32
    %c0_i32_0 = arith.constant 0 : i32
    return %arg0, %c0_i32 : i32, i32
  }
}

</mosaic_0001>

<bundles_post_ra>
// kernel: tpu_custom_call.1
= control target key start
LH: loop header
LB: loop body
LE: loop exit
PB: predicated region body
PF: predicated region fallthrough
CT: control target
= control target key end

     0   :  { %v197_v2 = vmov 0.0|0.0   ;;  %vm198_vm0 = vmmov 0   ;;  %v199_v4 = vmov 0.0   ;;  %s253_s0 = inlined_call_operand.vmem [shape: f32[24,16], index: 0, kind: input, shape index: {}]   ;;  %s254_s1 = inlined_call_operand.vmem [shape: f32[16,64], index: 1, kind: input, shape index: {}]   ;;  %s255_s2 = inlined_call_operand.vmem [shape: f32[1,64], index: 2, kind: input, shape index: {}]   ;;  %s256_s3 = inlined_call_operand.hbm [shape: f32[24,64], index: 3, kind: output, shape index: {}]  }
   0x1   :  { %v18_v0 = vld [vmem:[%s254_s1] sm:$0xff]  ;;  %v19_v1 = vld [vmem:[%s254_s1 + $0x8] sm:$0xff]  ;;  %165 = vmatprep.subr.bf16.mxu1 %v197_v2  ;;  %162 = vmatprep.subr.bf16.mxu0 %v197_v2 }
   0x2   :  { %v163_v3 = vpack.c.bf16 %v19_v1, %v18_v0  ;;  %156 = vmatprep.mubr.msk.f32.mxu1 %vm198_vm0, %v199_v4  ;;  %153 = vmatprep.mubr.msk.f32.mxu0 %vm198_vm0, %v199_v4 }
   0x3   :  { %8 = vsyncpa [#allocation3], 0  ;;  %v16_v5 = vld [vmem:[%s253_s0 + $0x8] sm:$0xff]  ;;  %vm27_vm1 = vcmask 130048   ;;  %v15_v6 = vld [vmem:[%s253_s0] sm:$0xff]  ;;  %vm120_vm2 = vcmask 523264  }
   0x4   :  { %166 = vmatpush3.bf16.msra.mxu1 %v163_v3  ;;  %164 = vmatpush3.bf16.msra.mxu0 %v163_v3  ;;  %v17_v7 = vld [vmem:[%s253_s0 + $0x10] sm:$0xff]  ;;  %v140_v8 = vld [vmem:[%s255_s2] ss:$0 sm:$0xff]  ;;  %s200_s23 = smov [#allocation2]  }
   0x5   :  { %s129_s24 = sshll.u32 %s200_s23, 4  ;;  %s130_s24 = int_to_ptr.vmem [resolvable:$true] %s129_s24 }
   0x6   :  { %s173_s0 = scalar_lea.vmem %s130_s24, 384  ;;  %p178_p1 = scmp.lt.s32.totalorder %s130_s24, %s130_s24 }
   0x7   :  { %157 = vmatmul.mubr.msk.f32.vlgmr.msra.gmra.mrb[0].mxu1 %vm27_vm1, %v16_v5  ;;  %154 = vmatmul.mubr.msk.f32.vlgmr.msra.gmra.mrb[0].mxu0 %vm27_vm1, %v15_v6  ;;  %p174_p0 = scmp.ne.s32.totalorder %s130_s24, %s173_s0  ;;  %p179_p2 = scmp.lt.s32.totalorder %s173_s0, %s173_s0 }
   0x8   :  { %159 = vmatprep.mubr.msk.f32.mxu1 %vm198_vm0, %v199_v4 }
   0x9   :  { %p180_p3 = por %p179_p2, %p178_p1 }
   0xb   :  { %160 = vmatmul.mubr.msk.f32.gmra.mrb[2].mxu1 %vm27_vm1, %v17_v7  ;;  %p181_p4 = pnand %p180_p3, %p174_p0 }
  0xda   :  { %v108_v9 = vpop.f32.mrb[0].mxu1  ;;  %v103_v10 = vpop.f32.mrb[0].mxu0 }
  0xdb   :  { %v109_v11 = vadd.f32 %v140_v8, %v108_v9  ;;  %v158_v12 = vpop.f32.mrb[1].mxu1  ;;  %v104_v13 = vadd.f32 %v140_v8, %v103_v10  ;;  %v155_v14 = vpop.f32.mrb[1].mxu0 }
  0xdd   :  { %v118_v15 = vmax.f32 %v109_v11, 0.0  ;;  %v117_v16 = vmax.f32 %v104_v13, 0.0 }
  0xde   :  { %v113_v17 = vpop.f32.mrb[2].mxu1 }
  0xdf   :  { %122 = vst.msk [vmem:[#allocation2 + $0x8] sm:$0xff] %vm120_vm2, %v118_v15  ;;  %121 = vst.msk [vmem:[#allocation2] sm:$0xff] %vm120_vm2, %v117_v16  ;;  %v114_v18 = vadd.f32 %v140_v8, %v113_v17  ;;  %v161_v19 = vpop.f32.mrb[3].mxu1 }
  0xe1   :  { %v119_v20 = vmax.f32 %v114_v18, 0.0 }
  0xe3   :  { %123 = vst.msk [vmem:[#allocation2 + $0x10] sm:$0xff] %vm120_vm2, %v119_v20 }
  0xe4   :  { %184 = shalt.err (!%p181_p4)
}
  0xe5   :  { %s185_s26 = scalar_lea.hbm %s256_s3, 384 }
  0xe6   :  { %p186_p5 = scmp.ne.s32.totalorder %s256_s3, %s185_s26  ;;  %p189_p6 = scmp.lt.u32.totalorder %s185_s26, %s256_s3 }
  0xe8   :  { %p191_p7 = pnand %p189_p6, %p186_p5 }
  0xea   :  { %194 = shalt.err (!%p191_p7)
}
  0xeb   :  { %s201_s4 = smov 128   ;;  %s202_s5 = smov 8  }
  0xec   :  { %135 = dma.vmem_to_hbm [thread:$0]  %s130_s24, 384, %s256_s3, [#allocation3], %s201_s4, %s201_s4, %s202_s5  }
  0xed   :  { %195 = dma.done.wait [#allocation3], 384  }
  0xee   :  { %196 = vsyncadd [#allocation3], 4294966912 }
  0xef   :  { %139 = vsyncpa [#allocation3], 1 }

</bundles_post_ra>
